<compile_context>
chip_gen: v5e
topology: v5e:2x2
jax: 0.10.0
libtpu: 0.0.40
codegen_flags: <defaults>
</compile_context>

<pallas_src>
import functools

import jax
import jax.numpy as jnp
from jax.experimental import pallas as pl
from jax.experimental.pallas import tpu as pltpu


def _scaled_tanh_kernel(x_ref, o_ref, *, scaling):
    # tanh -> EUP slot, scale multiply -> VPU slot; both hidden under the DMA stream.
    o_ref[...] = jnp.tanh(x_ref[...]) * scaling


_LANE = 128
_MAX_LANES = 2048                       # widest lane-dense slab we try for
_TARGET_TILE_BYTES = 2 * 1024 * 1024    # ~2 MiB blocks amortize ~0.35us/step overhead
_SMALL_BYTES = 512 * 1024               # below this, a single full-array block wins


def _cost(n_elems: int, itemsize: int) -> pl.CostEstimate:
    return pl.CostEstimate(
        flops=n_elems,                  # the scale multiply
        transcendentals=n_elems,        # tanh
        bytes_accessed=2 * n_elems * itemsize,
    )


def _scaled_tanh_single_block(x: jax.Array, scaling: float) -> jax.Array:
    # Whole array as one VMEM block (full-array block shape is always legal).
    kern = functools.partial(_scaled_tanh_kernel, scaling=scaling)
    return pl.pallas_call(
        kern,
        out_shape=jax.ShapeDtypeStruct(x.shape, x.dtype),
        cost_estimate=_cost(x.size, jnp.dtype(x.dtype).itemsize),
    )(x)


def _scaled_tanh_tiled(x: jax.Array, scaling: float) -> jax.Array:
    orig_shape = x.shape
    dtype = x.dtype
    itemsize = jnp.dtype(dtype).itemsize
    n = x.size

    # Pad at most to a 128-lane multiple (<=127 elements); for lane-aligned
    # sizes there is no pad/copy at all (vs. the old full-block pad + slice).
    n_pad = pl.cdiv(n, _LANE) * _LANE
    x_flat = x.reshape(-1)
    if n_pad != n:
        x_flat = jnp.pad(x_flat, (0, n_pad - n))

    # Widest lane-dense 2D view that divides the (padded) size exactly:
    # wider last dim -> larger contiguous DMAs and unmasked wide vector stores.
    width = _LANE
    for cand in range(_MAX_LANES, _LANE - 1, -_LANE):
        if n_pad % cand == 0:
            width = cand
            break
    rows = n_pad // width
    x2d = x_flat.reshape(rows, width)

    # ~2 MiB blocks: with in+out double-buffered that is ~8 MiB of VMEM, safely
    # under the scoped defaults of v5e (16 MiB) / v6e / v7x (32 MiB).
    tile_rows = max(16, (_TARGET_TILE_BYTES // (width * itemsize)) // 16 * 16)
    if tile_rows >= rows:
        # Keep at least 2 grid steps so v7x can shard the grid across its 2 TCs.
        half = (-(-rows // 2) + 15) // 16 * 16
        tile_rows = min(rows, max(16, half))
    grid = (pl.cdiv(rows, tile_rows),)   # partial last block is masked by Pallas

    kern = functools.partial(_scaled_tanh_kernel, scaling=scaling)
    out2d = pl.pallas_call(
        kern,
        out_shape=jax.ShapeDtypeStruct((rows, width), dtype),
        grid_spec=pltpu.PrefetchScalarGridSpec(
            num_scalar_prefetch=0,
            grid=grid,
            in_specs=[pl.BlockSpec((tile_rows, width), lambda i: (i, 0))],
            out_specs=pl.BlockSpec((tile_rows, width), lambda i: (i, 0)),
        ),
        compiler_params=pltpu.CompilerParams(
            dimension_semantics=("parallel",),
            vmem_limit_bytes=32 * 1024 * 1024,
        ),
        cost_estimate=_cost(n_pad, itemsize),
    )(x2d)

    out_flat = out2d.reshape(-1)
    if n_pad != n:
        out_flat = out_flat[:n]
    return out_flat.reshape(orig_shape)


def scaled_tanh(x: jax.Array, scaling: float) -> jax.Array:
    """Forward of ScaledTanH: y = tanh(x) * scaling, via a Pallas TPU kernel."""
    # NOTE: `scaling` is baked in as a trace-time constant (it is a fixed module
    # hyperparameter); a new value triggers a retrace, which is intended here.
    if x.size * jnp.dtype(x.dtype).itemsize <= _SMALL_BYTES:
        return _scaled_tanh_single_block(x, scaling)
    return _scaled_tanh_tiled(x, scaling)


if __name__ == "__main__":
    scaling = 2.5
    key = jax.random.PRNGKey(0)
    k0, k1, k2 = jax.random.split(key, 3)

    # Primary: small NCHW input matching the module's typical use (single-block path).
    x = jax.random.normal(k0, (2, 4, 16, 16), dtype=jnp.float32)
    y = jax.block_until_ready(scaled_tanh(x, scaling))
    assert jnp.allclose(y, jnp.tanh(x) * scaling, atol=1e-5, rtol=1e-5), "small-path mismatch"

    # Larger lane-aligned input: exercises the tiled (grid) path, 2 grid steps.
    x_big = jax.random.normal(k1, (2, 4, 256, 256), dtype=jnp.float32)
    y_big = jax.block_until_ready(scaled_tanh(x_big, scaling))
    assert jnp.allclose(y_big, jnp.tanh(x_big) * scaling, atol=1e-5, rtol=1e-5), "tiled-path mismatch"

    # Ragged size: exercises the minimal lane-pad + masked partial-block path.
    x_odd = jax.random.normal(k2, (3, 5, 97, 101), dtype=jnp.float32)
    y_odd = jax.block_until_ready(scaled_tanh(x_odd, scaling))
    assert jnp.allclose(y_odd, jnp.tanh(x_odd) * scaling, atol=1e-5, rtol=1e-5), "ragged-path mismatch"

    print("KERNEL_OK")
</pallas_src>

<mosaic_0001>
module attributes {stable_mosaic.version = 11 : i64} {
  func.func @_scaled_tanh_kernel(%arg0: memref<2x4x16x16xf32, #tpu.memory_space<vmem>>, %arg1: memref<2x4x16x16xf32, #tpu.memory_space<vmem>>) attributes {dimension_semantics = [], scalar_prefetch = 0 : i64, scratch_operands = 0 : i64, tpu.core_type = #tpu.core_type<tc>} {
    %c0 = arith.constant 0 : index
    %c0_0 = arith.constant 0 : index
    %c0_1 = arith.constant 0 : index
    %c0_2 = arith.constant 0 : index
    %0 = vector.load %arg0[%c0, %c0_0, %c0_1, %c0_2] : memref<2x4x16x16xf32, #tpu.memory_space<vmem>>, vector<2x4x16x16xf32>
    %1 = math.tanh %0 : vector<2x4x16x16xf32>
    %cst = arith.constant 2.500000e+00 : f32
    %2 = vector.broadcast %cst : f32 to vector<2x4x16x16xf32>
    %3 = arith.mulf %1, %2 : vector<2x4x16x16xf32>
    %c0_3 = arith.constant 0 : index
    %c0_4 = arith.constant 0 : index
    %c0_5 = arith.constant 0 : index
    %c0_6 = arith.constant 0 : index
    %4 = vector.load %arg1[%c0_3, %c0_4, %c0_5, %c0_6] : memref<2x4x16x16xf32, #tpu.memory_space<vmem>>, vector<2x4x16x16xf32>
    tpu.vector_store %arg1[%c0_3, %c0_4, %c0_5, %c0_6], %3 {strides = array<i32>} : memref<2x4x16x16xf32, #tpu.memory_space<vmem>>, vector<2x4x16x16xf32>,
    return
  }
}

</mosaic_0001>

<bundles_post_ra>
// kernel: tpu_custom_call.1
= control target key start
LH: loop header
LB: loop body
LE: loop exit
PB: predicated region body
PF: predicated region fallthrough
CT: control target
= control target key end

     0   :  { %6 = vsyncpa [#allocation3], 0  ;;  %s239_s0 = inlined_call_operand.hbm [shape: f32[2,4,16,16], index: 0, kind: input, shape index: {}]   ;;  %s240_s1 = inlined_call_operand.hbm [shape: f32[2,4,16,16], index: 1, kind: output, shape index: {}]  }
   0x1   :  { %7 = vsyncpa [#allocation4], 0  ;;  %s12_s8 = sshll.u32 %s239_s0, 4  ;;  %s197_s9 = smov [#allocation2]   ;;  %s13_s8 = int_to_ptr.hbm [resolvable:$true] %s12_s8 }
   0x2   :  { %s14_s10 = sshll.u32 %s197_s9, 4  ;;  %s198_s11 = smov 128   ;;  %s15_s10 = int_to_ptr.vmem [resolvable:$true] %s14_s10 }
   0x3   :  { %s199_s12 = smov 8  }
   0x4   :  { %20 = dma.hbm_to_vmem [thread:$0]  %s13_s8, 2048, %s15_s10, [#allocation3], %s198_s11, %s198_s11, %s199_s12  }
   0x5   :  { %193 = dma.done.wait [#allocation3], 2048  }
   0x6   :  { %194 = vsyncadd [#allocation3], 4294965248  ;;  %v25_v0 = vld [vmem:[#allocation2] sm:$0xff]  ;;  %v26_v1 = vld [vmem:[#allocation2 + $0x8] sm:$0xff]  ;;  %vm73_vm0 = vcmask 130048   ;;  %s200_s0 = smov [#allocation5]  }
   0x7   :  { %v27_v2 = vld [vmem:[#allocation2 + $0x10] sm:$0xff]  ;;  %113 = vtanh.f32 %v25_v0  ;;  %v28_v3 = vld [vmem:[#allocation2 + $0x18] sm:$0xff]  ;;  %v29_v4 = vld [vmem:[#allocation2 + $0x20] sm:$0xff]  ;;  %s94_s13 = sshll.u32 %s200_s0, 4  ;;  %s96_s16 = sshll.u32 %s240_s1, 4  ;;  %s95_s13 = int_to_ptr.vmem [resolvable:$true] %s94_s13  ;;  %s97_s16 = int_to_ptr.hbm [resolvable:$true] %s96_s16 }
   0x8   :  { %115 = vtanh.f32 %v26_v1  ;;  %v30_v5 = vld [vmem:[#allocation2 + $0x28] sm:$0xff]  ;;  %v31_v6 = vld [vmem:[#allocation2 + $0x30] sm:$0xff]  ;;  %v32_v7 = vld [vmem:[#allocation2 + $0x38] sm:$0xff] }
   0x9   :  { %117 = vtanh.f32 %v27_v2  ;;  %v33_v8 = vld [vmem:[#allocation2 + $0x40] sm:$0xff]  ;;  %v34_v10 = vld [vmem:[#allocation2 + $0x48] sm:$0xff]  ;;  %v35_v13 = vld [vmem:[#allocation2 + $0x50] sm:$0xff] }
   0xa   :  { %119 = vtanh.f32 %v28_v3  ;;  %v36_v16 = vld [vmem:[#allocation2 + $0x58] sm:$0xff]  ;;  %v37_v19 = vld [vmem:[#allocation2 + $0x60] sm:$0xff]  ;;  %v38_v22 = vld [vmem:[#allocation2 + $0x68] sm:$0xff] }
   0xb   :  { %121 = vtanh.f32 %v29_v4  ;;  %v39_v25 = vld [vmem:[#allocation2 + $0x70] sm:$0xff]  ;;  %v40_v28 = vld [vmem:[#allocation2 + $0x78] sm:$0xff] }
   0xc   :  { %123 = vtanh.f32 %v30_v5 }
   0xd   :  { %v114_v9 = vpop.eup %113  ;;  %125 = vtanh.f32 %v31_v6 }
   0xe   :  { %v116_v11 = vpop.eup %115  ;;  %v57_v12 = vmul.f32 2.5, %v114_v9  ;;  %127 = vtanh.f32 %v32_v7 }
   0xf   :  { %v118_v14 = vpop.eup %117  ;;  %v58_v15 = vmul.f32 2.5, %v116_v11  ;;  %129 = vtanh.f32 %v33_v8 }
  0x10   :  { %v120_v17 = vpop.eup %119  ;;  %74 = vst.msk [vmem:[#allocation5] sm:$0xff] %vm73_vm0, %v57_v12  ;;  %v59_v18 = vmul.f32 2.5, %v118_v14  ;;  %131 = vtanh.f32 %v34_v10 }
  0x11   :  { %v122_v20 = vpop.eup %121  ;;  %75 = vst.msk [vmem:[#allocation5 + $0x8] sm:$0xff] %vm73_vm0, %v58_v15  ;;  %v60_v21 = vmul.f32 2.5, %v120_v17  ;;  %133 = vtanh.f32 %v35_v13 }
  0x12   :  { %v124_v23 = vpop.eup %123  ;;  %76 = vst.msk [vmem:[#allocation5 + $0x10] sm:$0xff] %vm73_vm0, %v59_v18  ;;  %v61_v24 = vmul.f32 2.5, %v122_v20  ;;  %135 = vtanh.f32 %v36_v16 }
  0x13   :  { %v126_v26 = vpop.eup %125  ;;  %77 = vst.msk [vmem:[#allocation5 + $0x18] sm:$0xff] %vm73_vm0, %v60_v21  ;;  %v62_v27 = vmul.f32 2.5, %v124_v23  ;;  %137 = vtanh.f32 %v37_v19 }
  0x14   :  { %v128_v29 = vpop.eup %127  ;;  %78 = vst.msk [vmem:[#allocation5 + $0x20] sm:$0xff] %vm73_vm0, %v61_v24  ;;  %v63_v30 = vmul.f32 2.5, %v126_v26  ;;  %139 = vtanh.f32 %v38_v22 }
  0x15   :  { %v130_v31 = vpop.eup %129  ;;  %79 = vst.msk [vmem:[#allocation5 + $0x28] sm:$0xff] %vm73_vm0, %v62_v27  ;;  %v64_v32 = vmul.f32 2.5, %v128_v29  ;;  %141 = vtanh.f32 %v39_v25 }
  0x16   :  { %v132_v33 = vpop.eup %131  ;;  %80 = vst.msk [vmem:[#allocation5 + $0x30] sm:$0xff] %vm73_vm0, %v63_v30  ;;  %v65_v34 = vmul.f32 2.5, %v130_v31  ;;  %143 = vtanh.f32 %v40_v28 }
  0x17   :  { %v134_v35 = vpop.eup %133  ;;  %81 = vst.msk [vmem:[#allocation5 + $0x38] sm:$0xff] %vm73_vm0, %v64_v32  ;;  %v66_v36 = vmul.f32 2.5, %v132_v33 }
  0x18   :  { %v136_v37 = vpop.eup %135  ;;  %82 = vst.msk [vmem:[#allocation5 + $0x40] sm:$0xff] %vm73_vm0, %v65_v34  ;;  %v67_v38 = vmul.f32 2.5, %v134_v35 }
  0x19   :  { %v138_v39 = vpop.eup %137  ;;  %83 = vst.msk [vmem:[#allocation5 + $0x48] sm:$0xff] %vm73_vm0, %v66_v36  ;;  %v68_v40 = vmul.f32 2.5, %v136_v37 }
  0x1a   :  { %v140_v41 = vpop.eup %139  ;;  %84 = vst.msk [vmem:[#allocation5 + $0x50] sm:$0xff] %vm73_vm0, %v67_v38  ;;  %v69_v42 = vmul.f32 2.5, %v138_v39 }
  0x1b   :  { %v142_v43 = vpop.eup %141  ;;  %85 = vst.msk [vmem:[#allocation5 + $0x58] sm:$0xff] %vm73_vm0, %v68_v40  ;;  %v70_v44 = vmul.f32 2.5, %v140_v41 }
  0x1c   :  { %v144_v45 = vpop.eup %143  ;;  %86 = vst.msk [vmem:[#allocation5 + $0x60] sm:$0xff] %vm73_vm0, %v69_v42  ;;  %v71_v46 = vmul.f32 2.5, %v142_v43 }
  0x1d   :  { %87 = vst.msk [vmem:[#allocation5 + $0x68] sm:$0xff] %vm73_vm0, %v70_v44  ;;  %v72_v47 = vmul.f32 2.5, %v144_v45 }
  0x1e   :  { %88 = vst.msk [vmem:[#allocation5 + $0x70] sm:$0xff] %vm73_vm0, %v71_v46 }
  0x1f   :  { %89 = vst.msk [vmem:[#allocation5 + $0x78] sm:$0xff] %vm73_vm0, %v72_v47 }
  0x20   :  { %102 = dma.vmem_to_hbm [thread:$0]  %s95_s13, 2048, %s97_s16, [#allocation4], %s198_s11, %s198_s11, %s199_s12  }
  0x21   :  { %195 = dma.done.wait [#allocation4], 2048  }
  0x22   :  { %196 = vsyncadd [#allocation4], 4294965248 }
  0x23   :  { %107 = vsyncpa [#allocation3], 1 }
  0x24   :  { %108 = vsyncpa [#allocation4], 1 }

</bundles_post_ra>
